<compile_context>
chip_gen: v7x
topology: tpu7x:2x2x1
jax: 0.10.0
libtpu: 0.0.40
codegen_flags: <defaults>
</compile_context>

<pallas_src>
import jax
import jax.numpy as jnp
from jax.experimental import pallas as pl
from jax.experimental.pallas import tpu as pltpu


def _value_net_kernel(x_ref, w1_ref, b1_ref, w2_ref, b2_ref, o_ref):
    # x_ref : (TB, D)       input tile, natural layout (pipelined per grid step)
    # w1_ref: (D, H)        layer-1 weight, VMEM-resident
    # b1_ref: (1, H)        layer-1 bias
    # w2_ref: (H, out_dim)  layer-2 weight, VMEM-resident
    # b2_ref: (1, out_dim)  layer-2 bias
    # o_ref : (TB, out_dim) output tile
    # Layer 1 on the MXU with f32 accumulation (inputs may be bf16/fp8 or f32).
    h = jnp.dot(x_ref[...], w1_ref[...], preferred_element_type=jnp.float32)
    h = jnp.maximum(h + b1_ref[...], 0.0)
    # Layer 2 (tiny H x out_dim contraction). The kernel is HBM-bound, so MXU
    # shape/utilization here is irrelevant — keep the plain dot.
    out = jnp.dot(h, w2_ref[...], preferred_element_type=jnp.float32)
    o_ref[...] = (out + b2_ref[...]).astype(o_ref.dtype)


def value_network_forward(x, w1, b1, w2, b2, *, block_b=1024, input_dtype=None):
    """Forward pass of Linear(D->H) + ReLU + Linear(H->out_dim).

    Args:
      x : (B, D) float32 input.
      w1: (D, H)       layer-1 weight (in_features x out_features).
      b1: (H,)         layer-1 bias.
      w2: (H, out_dim) layer-2 weight.
      b2: (out_dim,)   layer-2 bias.
      block_b: desired batch tile (rounded to a multiple of 128).
      input_dtype: optional reduced dtype for x/w1 at the HBM boundary
        (e.g. jnp.bfloat16; jnp.float8_e4m3fn on v7x). Accumulation stays f32.
    Returns: (B, out_dim) float32 — same semantics as the PyTorch module.
    """
    B, D = x.shape
    H = w1.shape[1]
    out_dim = w2.shape[1]

    if input_dtype is not None:
        # Cast at the HBM boundary: halves the bytes of the dominant tensor
        # and makes the layer-1 matmul MXU-native. No in-kernel cast.
        x = x.astype(input_dtype)
        w1 = w1.astype(input_dtype)

    b1c = b1.reshape(1, H).astype(jnp.float32)
    b2c = b2.reshape(1, out_dim).astype(jnp.float32)

    # Batch tile: multiple of 128 sublanes; for B > 256 clamp so the grid has
    # >= 2 steps (lets v7x's two TensorCores split the batch). For small B a
    # single full-batch block (block dim == full array dim) is used.
    tb = max(128, (block_b // 128) * 128)
    if B > 256:
        tb = min(tb, pl.cdiv(pl.cdiv(B, 2), 128) * 128)
    if tb >= B:
        tb = B
    grid = (pl.cdiv(B, tb),)

    out = pl.pallas_call(
        _value_net_kernel,
        out_shape=jax.ShapeDtypeStruct((B, out_dim), jnp.float32),
        grid=grid,
        in_specs=[
            pl.BlockSpec((tb, D), lambda i: (i, 0)),        # x tile (pipelined)
            pl.BlockSpec((D, H), lambda i: (0, 0)),         # VMEM-resident
            pl.BlockSpec((1, H), lambda i: (0, 0)),         # VMEM-resident
            pl.BlockSpec((H, out_dim), lambda i: (0, 0)),   # VMEM-resident
            pl.BlockSpec((1, out_dim), lambda i: (0, 0)),   # VMEM-resident
        ],
        out_specs=pl.BlockSpec((tb, out_dim), lambda i: (i, 0)),
        compiler_params=pltpu.CompilerParams(
            # Independent batch tiles -> megacore splits them on v7x.
            dimension_semantics=("parallel",),
        ),
    )(x, w1, b1c, w2, b2c)

    return out


def init_params(key, input_dim=128, hidden=32, output_dim=1):
    # PyTorch nn.Linear default init: U(-1/sqrt(fan_in), 1/sqrt(fan_in)).
    k1, k2, k3, k4 = jax.random.split(key, 4)
    bound1 = 1.0 / jnp.sqrt(input_dim)
    bound2 = 1.0 / jnp.sqrt(hidden)
    w1 = jax.random.uniform(k1, (input_dim, hidden), jnp.float32, -bound1, bound1)
    b1 = jax.random.uniform(k2, (hidden,), jnp.float32, -bound1, bound1)
    w2 = jax.random.uniform(k3, (hidden, output_dim), jnp.float32, -bound2, bound2)
    b2 = jax.random.uniform(k4, (output_dim,), jnp.float32, -bound2, bound2)
    return w1, b1, w2, b2


if __name__ == "__main__":
    key = jax.random.PRNGKey(0)
    k_in, k_in2, k_par = jax.random.split(key, 3)

    input_dim, hidden, output_dim = 128, 32, 1
    w1, b1, w2, b2 = init_params(k_par, input_dim, hidden, output_dim)

    fwd = jax.jit(value_network_forward, static_argnames=("block_b", "input_dtype"))

    hp = jax.lax.Precision.HIGHEST

    def ref_fn(xv):
        hh = jnp.maximum(jnp.dot(xv, w1, precision=hp) + b1[None, :], 0.0)
        return jnp.dot(hh, w2, precision=hp) + b2[None, :]

    # Small batch (B=8), f32 — matches the PyTorch module's forward semantics.
    x8 = jax.random.normal(k_in, (8, input_dim), jnp.float32)
    out8 = jax.block_until_ready(fwd(x8, w1, b1, w2, b2))
    assert out8.shape == (8, output_dim)
    assert jnp.allclose(out8, ref_fn(x8), atol=1e-4, rtol=1e-4)

    # Non-multiple-of-tile batch: exercises grid > 1, the masked boundary
    # block, and v7x's >=2-step parallel split (no wrapper-side pad of x).
    x300 = jax.random.normal(k_in2, (300, input_dim), jnp.float32)
    out300 = jax.block_until_ready(fwd(x300, w1, b1, w2, b2))
    assert out300.shape == (300, output_dim)
    assert jnp.allclose(out300, ref_fn(x300), atol=1e-4, rtol=1e-4)

    # bf16 boundary-cast path (f32 accumulation), looser tolerance.
    out_bf16 = jax.block_until_ready(
        fwd(x300, w1, b1, w2, b2, input_dtype=jnp.bfloat16))
    assert jnp.allclose(out_bf16, ref_fn(x300), atol=5e-2, rtol=5e-2)

    print("KERNEL_OK")
</pallas_src>

<mosaic_0001>
module attributes {stable_mosaic.version = 11 : i64} {
  func.func @_value_net_kernel(%arg0: i32, %arg1: memref<8x128xf32, #tpu.memory_space<vmem>>, %arg2: memref<128x32xf32, #tpu.memory_space<vmem>>, %arg3: memref<1x32xf32, #tpu.memory_space<vmem>>, %arg4: memref<32x1xf32, #tpu.memory_space<vmem>>, %arg5: memref<1x1xf32, #tpu.memory_space<vmem>>, %arg6: memref<8x1xf32, #tpu.memory_space<vmem>>) attributes {dimension_semantics = [#tpu.dimension_semantics<parallel>], iteration_bounds = array<i64: 1>, scalar_prefetch = 0 : i64, scratch_operands = 0 : i64, tpu.core_type = #tpu.core_type<tc>, window_params = [{transform_indices = @transform_0, window_bounds = array<i64: 8, 128>}, {pipeline_mode = #tpu.pipeline_mode<synchronous>, transform_indices = @transform_1, window_bounds = array<i64: 128, 32>}, {pipeline_mode = #tpu.pipeline_mode<synchronous>, transform_indices = @transform_2, window_bounds = array<i64: 1, 32>}, {pipeline_mode = #tpu.pipeline_mode<synchronous>, transform_indices = @transform_3, window_bounds = array<i64: 32, 1>}, {pipeline_mode = #tpu.pipeline_mode<synchronous>, transform_indices = @transform_4, window_bounds = array<i64: 1, 1>}, {transform_indices = @transform_5, window_bounds = array<i64: 8, 1>}]} {
    %c0 = arith.constant 0 : index
    %c0_0 = arith.constant 0 : index
    %0 = vector.load %arg1[%c0, %c0_0] : memref<8x128xf32, #tpu.memory_space<vmem>>, vector<8x128xf32>
    %c0_1 = arith.constant 0 : index
    %c0_2 = arith.constant 0 : index
    %1 = vector.load %arg2[%c0_1, %c0_2] : memref<128x32xf32, #tpu.memory_space<vmem>>, vector<128x32xf32>
    %cst = arith.constant dense<0.000000e+00> : vector<8x32xf32>
    %2 = tpu.matmul %0, %1, %cst {dimension_numbers = #tpu.dot_dimension_numbers<[1], [0], [0], [1], [0, 0, 1, 1], [], []>} : vector<8x128xf32>, vector<128x32xf32>, vector<8x32xf32> -> vector<8x32xf32>
    %c0_3 = arith.constant 0 : index
    %c0_4 = arith.constant 0 : index
    %3 = vector.load %arg3[%c0_3, %c0_4] : memref<1x32xf32, #tpu.memory_space<vmem>>, vector<1x32xf32>
    %4 = vector.broadcast %3 : vector<1x32xf32> to vector<8x32xf32>
    %5 = arith.addf %2, %4 : vector<8x32xf32>
    %cst_5 = arith.constant 0.000000e+00 : f32
    %6 = vector.broadcast %cst_5 : f32 to vector<8x32xf32>
    %7 = arith.maximumf %5, %6 : vector<8x32xf32>
    %c0_6 = arith.constant 0 : index
    %c0_7 = arith.constant 0 : index
    %8 = vector.load %arg4[%c0_6, %c0_7] : memref<32x1xf32, #tpu.memory_space<vmem>>, vector<32x1xf32>
    %cst_8 = arith.constant dense<0.000000e+00> : vector<8x1xf32>
    %9 = tpu.matmul %7, %8, %cst_8 {dimension_numbers = #tpu.dot_dimension_numbers<[1], [0], [0], [1], [0, 0, 1, 1], [], []>} : vector<8x32xf32>, vector<32x1xf32>, vector<8x1xf32> -> vector<8x1xf32>
    %c0_9 = arith.constant 0 : index
    %c0_10 = arith.constant 0 : index
    %10 = vector.load %arg5[%c0_9, %c0_10] : memref<1x1xf32, #tpu.memory_space<vmem>>, vector<1x1xf32>
    %11 = vector.broadcast %10 : vector<1x1xf32> to vector<8x1xf32>
    %12 = arith.addf %9, %11 : vector<8x1xf32>
    %c0_11 = arith.constant 0 : index
    %c0_12 = arith.constant 0 : index
    %13 = vector.load %arg6[%c0_11, %c0_12] : memref<8x1xf32, #tpu.memory_space<vmem>>, vector<8x1xf32>
    tpu.vector_store %arg6[%c0_11, %c0_12], %12 {strides = array<i32>} : memref<8x1xf32, #tpu.memory_space<vmem>>, vector<8x1xf32>,
    return
  }
  func.func @transform_0(%arg0: i32) -> (i32, i32) {
    %c0_i32 = arith.constant 0 : i32
    %c0_i32_0 = arith.constant 0 : i32
    return %arg0, %c0_i32 : i32, i32
  }
  func.func @transform_1(%arg0: i32) -> (i32, i32) {
    %c0_i32 = arith.constant 0 : i32
    %c0_i32_0 = arith.constant 0 : i32
    %c0_i32_1 = arith.constant 0 : i32
    return %c0_i32, %c0_i32_0 : i32, i32
  }
  func.func @transform_2(%arg0: i32) -> (i32, i32) {
    %c0_i32 = arith.constant 0 : i32
    %c0_i32_0 = arith.constant 0 : i32
    %c0_i32_1 = arith.constant 0 : i32
    return %c0_i32, %c0_i32_0 : i32, i32
  }
  func.func @transform_3(%arg0: i32) -> (i32, i32) {
    %c0_i32 = arith.constant 0 : i32
    %c0_i32_0 = arith.constant 0 : i32
    %c0_i32_1 = arith.constant 0 : i32
    return %c0_i32, %c0_i32_0 : i32, i32
  }
  func.func @transform_4(%arg0: i32) -> (i32, i32) {
    %c0_i32 = arith.constant 0 : i32
    %c0_i32_0 = arith.constant 0 : i32
    %c0_i32_1 = arith.constant 0 : i32
    return %c0_i32, %c0_i32_0 : i32, i32
  }
  func.func @transform_5(%arg0: i32) -> (i32, i32) {
    %c0_i32 = arith.constant 0 : i32
    %c0_i32_0 = arith.constant 0 : i32
    return %arg0, %c0_i32 : i32, i32
  }
}

</mosaic_0001>

<bundles_post_ra>
// kernel: value_network_forward.1
= control target key start
LH: loop header
LB: loop body
LE: loop exit
PB: predicated region body
PF: predicated region fallthrough
CT: control target
= control target key end

     0   :  { %v312_v0 = vmov 0.0|0.0   ;;  %vm313_vm0 = vmmov 0   ;;  %v314_v4 = vmov 0.0   ;;  %vm128_vm1 = vcmask 261120   ;;  %s417_s1 = inlined_call_operand.vmem [shape: f32[128,32], index: 1, kind: input, shape index: {}]   ;;  %s418_s3 = inlined_call_operand.vmem [shape: f32[32,1], index: 3, kind: input, shape index: {}]   ;;  %s419_s0 = inlined_call_operand.vmem [shape: f32[8,128], index: 0, kind: input, shape index: {}]   ;;  %s420_s4 = inlined_call_operand.<no memory space> [shape: f32[1,1], index: 4, kind: input, shape index: {}]   ;;  %s421_s2 = inlined_call_operand.vmem [shape: f32[1,32], index: 2, kind: input, shape index: {}]   ;;  %s422_s5 = inlined_call_operand.vmem [shape: f32[8,1], index: 5, kind: output, shape index: {}]  }
   0x1   :  { %279 = vmatprep.subr.bf16.mxu0 %v312_v0  ;;  %v23_v1 = vld [vmem:[%s417_s1] sm:$0xff]  ;;  %v24_v2 = vld [vmem:[%s417_s1 + $0x8] sm:$0xff]  ;;  %v25_v3 = vld [vmem:[%s417_s1 + $0x10] sm:$0xff]  ;;  %265 = vmatprep.mubr.msk.f32.mxu0 %vm313_vm0, %v314_v4  ;;  %v10_v33 = vstv %s420_s4  ;;  %vm202_vm2 = vcmask 7168  }
   0x2   :  { %v280_v5 = vpack.c.bf16 %v24_v2, %v23_v1  ;;  %v26_v6 = vld [vmem:[%s417_s1 + $0x18] sm:$0xff]  ;;  %303 = vmatprep.subr.bf16.mxu1 %v312_v0  ;;  %276 = vmatprep.mubr.msk.f32.mxu1 %vm313_vm0, %v314_v4  ;;  %v27_v8 = vld [vmem:[%s417_s1 + $0x20] sm:$0xff]  ;;  %v28_v9 = vld [vmem:[%s417_s1 + $0x28] sm:$0xff]  ;;  %11 = vst [vmem:[#allocation2] sm:$0x1] %v10_v33 }
   0x3   :  { %v283_v7 = vpack.c.bf16 %v26_v6, %v25_v3  ;;  %v117_v10 = vld [vmem:[%s418_s3] sm:$0xff]  ;;  %v118_v11 = vld [vmem:[%s418_s3 + $0x8] sm:$0xff]  ;;  %v286_v12 = vpack.c.bf16 %v28_v9, %v27_v8  ;;  %v29_v14 = vld [vmem:[%s417_s1 + $0x30] sm:$0xff] }
   0x4   :  { %281 = vmatpush3.bf16.msra.mxu0 %v280_v5  ;;  %v304_v13 = vpack.c.bf16 %v118_v11, %v117_v10  ;;  %v30_v15 = vld [vmem:[%s417_s1 + $0x38] sm:$0xff]  ;;  %v31_v17 = vld [vmem:[%s417_s1 + $0x40] sm:$0xff]  ;;  %v32_v18 = vld [vmem:[%s417_s1 + $0x48] sm:$0xff] }
   0x5   :  { %282 = vmatprep.subr.bf16.mxu0 %v312_v0  ;;  %v289_v16 = vpack.c.bf16 %v30_v15, %v29_v14  ;;  %v292_v19 = vpack.c.bf16 %v32_v18, %v31_v17  ;;  %v33_v20 = vld [vmem:[%s417_s1 + $0x50] sm:$0xff]  ;;  %v34_v21 = vld [vmem:[%s417_s1 + $0x58] sm:$0xff]  ;;  %v35_v23 = vld [vmem:[%s417_s1 + $0x60] sm:$0xff] }
   0x6   :  { %305 = vmatpush3.bf16.msra.mxu1 %v304_v13  ;;  %v295_v22 = vpack.c.bf16 %v34_v21, %v33_v20  ;;  %v36_v24 = vld [vmem:[%s417_s1 + $0x68] sm:$0xff]  ;;  %v37_v26 = vld [vmem:[%s417_s1 + $0x70] sm:$0xff]  ;;  %v38_v27 = vld [vmem:[%s417_s1 + $0x78] sm:$0xff] }
   0x7   :  { %306 = vmatprep.subr.bf16.mxu1 %v312_v0  ;;  %v298_v25 = vpack.c.bf16 %v36_v24, %v35_v23  ;;  %v301_v28 = vpack.c.bf16 %v38_v27, %v37_v26  ;;  %v22_v29 = vld [vmem:[%s419_s0] sm:$0xff]  ;;  %v119_v30 = vld [vmem:[%s418_s3 + $0x10] sm:$0xff]  ;;  %v120_v31 = vld [vmem:[%s418_s3 + $0x18] sm:$0xff] }
   0x8   :  { %284 = vmatpush3.bf16.msra.mxu0 %v283_v7  ;;  %v307_v32 = vpack.c.bf16 %v120_v31, %v119_v30  ;;  %v208_v34 = vld [vmem:[%s421_s2] ss:$0 sm:$0xff] }
   0x9   :  { %285 = vmatprep.subr.bf16.mxu0 %v312_v0  ;;  %v209_v39 = vld [vmem:[#allocation2] ss:$0 sm:$0xff] }
   0xa   :  { %308 = vmatpush3.bf16.msra.mxu1 %v307_v32 }
   0xc   :  { %287 = vmatpush3.bf16.msra.mxu0 %v286_v12 }
   0xd   :  { %288 = vmatprep.subr.bf16.mxu0 %v312_v0 }
  0x10   :  { %290 = vmatpush3.bf16.msra.mxu0 %v289_v16 }
  0x11   :  { %291 = vmatprep.subr.bf16.mxu0 %v312_v0 }
  0x14   :  { %293 = vmatpush3.bf16.msra.mxu0 %v292_v19 }
  0x15   :  { %294 = vmatprep.subr.bf16.mxu0 %v312_v0 }
  0x18   :  { %296 = vmatpush3.bf16.msra.mxu0 %v295_v22 }
  0x19   :  { %297 = vmatprep.subr.bf16.mxu0 %v312_v0 }
  0x1c   :  { %299 = vmatpush3.bf16.msra.mxu0 %v298_v25 }
  0x1d   :  { %300 = vmatprep.subr.bf16.mxu0 %v312_v0 }
  0x20   :  { %302 = vmatpush3.bf16.msra.mxu0 %v301_v28 }
  0x23   :  { %266 = vmatmul.mubr.f32.vlgmr.msra.gmra.mrb[0].mxu0 %v22_v29 }
  0xf6   :  { %v112_v35 = vpop.f32.mrb[0].mxu0 }
  0xf7   :  { %v113_v36 = vadd.f32 %v208_v34, %v112_v35  ;;  %v267_v37 = vpop.f32.mrb[1].mxu0 }
  0xf9   :  { %v116_v38 = vmax.f32 %v113_v36, 0.0 }
  0xfb   :  { %277 = vmatmul.mubr.msk.f32.vlgmr.msra.gmra.mrb[0].mxu1 %vm128_vm1, %v116_v38 }
 0x1ce   :  { %v198_v40 = vpop.f32.mrb[0].mxu1 }
 0x1cf   :  { %v199_v41 = vadd.f32 %v209_v39, %v198_v40  ;;  %v278_v42 = vpop.f32.mrb[1].mxu1 }
 0x1d1   :  { %203 = vst.msk [vmem:[%s422_s5] sm:$0xff] %vm202_vm2, %v199_v41 }

</bundles_post_ra>
